<compile_context>
chip_gen: v7x
topology: tpu7x:2x2x1
jax: 0.10.0
libtpu: 0.0.40
codegen_flags: <defaults>
</compile_context>

<pallas_src>
import jax
import jax.numpy as jnp
from jax.experimental import pallas as pl
from jax.experimental.pallas import tpu as pltpu


def force_pair(v):
    if isinstance(v, (tuple, list)):
        assert len(v) == 2
        return (int(v[0]), int(v[1]))
    return (int(v), int(v))


def _round_up(a, b):
    return -(-a // b) * b


# ----------------------------- Pallas kernel ------------------------------ #

def _gemm_kernel(w_ref, x_ref, o_ref):
    # w_ref: (TC, K)      one row-tile of the stationary phase-weight matrix (bf16)
    # x_ref: (1, K, TM)   one lane-dense M tile of the phase-im2col slab (bf16)
    # o_ref: (1, TC, TM)  f32 output tile
    o_ref[0] = jnp.dot(
        w_ref[...], x_ref[0], preferred_element_type=jnp.float32
    ).astype(o_ref.dtype)


# ------------------------------- wrapper ----------------------------------- #

def conv_transpose2d_pallas(x, weight, stride=1, padding=0):
    """torch.nn.functional.conv_transpose2d (bias=False, groups=1, dilation=1).

    x:      (N, Ci, H, W)       float32
    weight: (Ci, Co, kH, kW)    float32 (torch ConvTranspose2d layout)
    """
    # TODO(synk): output_padding, groups and dilation are not supported.
    sh, sw = force_pair(stride)
    ph, pw = force_pair(padding)
    N, Ci, H, W = x.shape
    Ci_w, Co, kH, kW = weight.shape
    assert Ci == Ci_w
    Ho = (H - 1) * sh - 2 * ph + kH
    Wo = (W - 1) * sw - 2 * pw + kW
    assert Ho > 0 and Wo > 0

    # --- phase (sub-pixel) geometry ---------------------------------------- #
    Ah = -(-kH // sh)            # height taps per phase (padded to uniform)
    Bw = -(-kW // sw)            # width  taps per phase
    A1, B1 = Ah - 1, Bw - 1
    Qh, Qw = H + A1, W + B1      # per-phase output extent
    M = Qh * Qw
    CoT = sh * sw * Co           # all phases stacked on the GEMM height
    K = Ah * Bw * Ci             # full contraction depth (taps folded into K)

    # --- weight -> (CoT, K) phase matrix, missing taps zero-padded ---------- #
    # wmat[(r*sw+c)*Co+co, (a*Bw+b)*Ci+ci] = W[ci, co, r+a*sh, c+b*sw] (or 0)
    w_bf = weight.astype(jnp.bfloat16)
    w_pad = jnp.pad(w_bf, ((0, 0), (0, 0), (0, Ah * sh - kH), (0, Bw * sw - kW)))
    w6 = w_pad.reshape(Ci, Co, Ah, sh, Bw, sw)               # [ci,co,a,r,b,c]
    wmat = w6.transpose(3, 5, 1, 2, 4, 0).reshape(CoT, K)    # [(r,c,co),(a,b,ci)]

    # --- tile the stacked-phase output-channel axis ------------------------- #
    CoT_pad = _round_up(CoT, 8)
    if CoT_pad > 512:
        TC = 512
        CoT_pad = _round_up(CoT_pad, TC)
    else:
        TC = CoT_pad
    n_ct = CoT_pad // TC
    wmat = jnp.pad(wmat, ((0, CoT_pad - CoT), (0, 0)))

    # --- input -> small phase-im2col slab (N, K, M), bf16 ------------------- #
    # slab[n, (a*Bw+b)*Ci+ci, qh*Qw+qw] = x[n, ci, qh-a, qw-b]  (0 outside)
    x_bf = x.astype(jnp.bfloat16)
    x_zp = jnp.pad(x_bf, ((0, 0), (0, 0), (A1, A1), (B1, B1)))
    taps = []
    for a in range(Ah):
        for b in range(Bw):
            taps.append(x_zp[:, :, A1 - a:A1 - a + Qh, B1 - b:B1 - b + Qw])
    xcols = jnp.stack(taps, axis=1).reshape(N, K, M)

    # --- lane-dense M tiling ------------------------------------------------ #
    TM = 128 if M <= 2048 else 512            # multiple of 128 -> unmasked vst
    n_mt = -(-M // TM)
    M_pad = n_mt * TM
    xcols = jnp.pad(xcols, ((0, 0), (0, 0), (0, M_pad - M)))

    out_flat = pl.pallas_call(
        _gemm_kernel,
        out_shape=jax.ShapeDtypeStruct((N, CoT_pad, M_pad), jnp.float32),
        grid_spec=pltpu.PrefetchScalarGridSpec(
            num_scalar_prefetch=0,
            grid=(N, n_ct, n_mt),
            in_specs=[
                # weight tile: constant across batch and inner M axis
                pl.BlockSpec((TC, K), lambda n, ct, mt: (ct, 0)),
                pl.BlockSpec((1, K, TM), lambda n, ct, mt: (n, 0, mt)),
            ],
            out_specs=pl.BlockSpec((1, TC, TM), lambda n, ct, mt: (n, ct, mt)),
        ),
        compiler_params=pltpu.CompilerParams(
            dimension_semantics=("parallel", "parallel", "parallel"),
        ),
    )(wmat, xcols)

    # --- interleave phases (pixel shuffle) and crop ------------------------- #
    P = out_flat[:, :CoT, :M].reshape(N, sh, sw, Co, Qh, Qw)
    F = P.transpose(0, 3, 4, 1, 5, 2).reshape(N, Co, Qh * sh, Qw * sw)
    return F[:, :, ph:ph + Ho, pw:pw + Wo]


# -------------------------- independent reference -------------------------- #

def conv_transpose2d_ref(x, weight, stride, padding):
    """Scatter-based reference (shares no phase/im2col machinery w/ kernel)."""
    sh, sw = force_pair(stride)
    ph, pw = force_pair(padding)
    N, Ci, H, W = x.shape
    _, Co, kH, kW = weight.shape
    Ho = (H - 1) * sh - 2 * ph + kH
    Wo = (W - 1) * sw - 2 * pw + kW
    out_full = jnp.zeros((N, Co, (H - 1) * sh + kH, (W - 1) * sw + kW), jnp.float32)
    for kh in range(kH):
        for kw in range(kW):
            contrib = jnp.einsum("nihw,io->nohw", x, weight[:, :, kh, kw],
                                 precision=jax.lax.Precision.HIGHEST)
            out_full = out_full.at[
                :, :, kh:kh + (H - 1) * sh + 1:sh, kw:kw + (W - 1) * sw + 1:sw
            ].add(contrib)
    return out_full[:, :, ph:ph + Ho, pw:pw + Wo]


# ---------------------------------- main ------------------------------------ #

if __name__ == "__main__":
    # Module config (typical GAN upsampling block, small sizes):
    in_channels, out_channels = 4, 8
    kernel_size, stride, padding = 4, 2, 1
    batch, H, W = 2, 16, 16
    kH, kW = force_pair(kernel_size)

    key = jax.random.PRNGKey(0)
    kx, kw_ = jax.random.split(key)

    # Deterministic init mirroring the module:
    #   sf = 1 / sqrt(out_channels * kH * kW); weight ~ U(-sf, sf)
    sf = 1.0 / (out_channels * kH * kW) ** 0.5
    weight = sf * (
        2.0 * jax.random.uniform(kw_, (in_channels, out_channels, kH, kW),
                                 dtype=jnp.float32) - 1.0
    )
    x = jax.random.normal(kx, (batch, in_channels, H, W), dtype=jnp.float32)

    fwd = jax.jit(conv_transpose2d_pallas, static_argnames=("stride", "padding"))
    out = fwd(x, weight, stride=stride, padding=padding)
    out = jax.block_until_ready(out)

    Ho = (H - 1) * stride - 2 * padding + kH
    Wo = (W - 1) * stride - 2 * padding + kW
    assert out.shape == (batch, out_channels, Ho, Wo), out.shape

    # The kernel feeds the MXU bf16-rounded operands (f32 accumulation), so:
    #  (a) tight check vs an f32 reference built from the same rounded operands,
    #  (b) loose check vs the pure-f32 reference (operand-rounding tolerance).
    x_r = x.astype(jnp.bfloat16).astype(jnp.float32)
    w_r = weight.astype(jnp.bfloat16).astype(jnp.float32)
    ref_bf = conv_transpose2d_ref(x_r, w_r, stride, padding)
    ref_f32 = conv_transpose2d_ref(x, weight, stride, padding)
    assert jnp.allclose(out, ref_bf, rtol=1e-4, atol=1e-4), \
        float(jnp.max(jnp.abs(out - ref_bf)))
    assert jnp.allclose(out, ref_f32, rtol=2e-2, atol=2e-2), \
        float(jnp.max(jnp.abs(out - ref_f32)))

    print("KERNEL_OK")
</pallas_src>

<mosaic_0001>
module attributes {stable_mosaic.version = 11 : i64} {
  func.func @_gemm_kernel(%arg0: i32, %arg1: i32, %arg2: i32, %arg3: memref<32x16xbf16, #tpu.memory_space<vmem>>, %arg4: memref<1x16x128xbf16, #tpu.memory_space<vmem>>, %arg5: memref<1x32x128xf32, #tpu.memory_space<vmem>>) attributes {dimension_semantics = [#tpu.dimension_semantics<parallel>, #tpu.dimension_semantics<parallel>, #tpu.dimension_semantics<parallel>], iteration_bounds = array<i64: 2, 1, 3>, scalar_prefetch = 0 : i64, scratch_operands = 0 : i64, tpu.core_type = #tpu.core_type<tc>, window_params = [{transform_indices = @transform_0, window_bounds = array<i64: 32, 16>}, {transform_indices = @transform_1, window_bounds = array<i64: 1, 16, 128>}, {transform_indices = @transform_2, window_bounds = array<i64: 1, 32, 128>}]} {
    %c0 = arith.constant 0 : index
    %c0_0 = arith.constant 0 : index
    %0 = vector.load %arg3[%c0, %c0_0] : memref<32x16xbf16, #tpu.memory_space<vmem>>, vector<32x16xbf16>
    %c0_1 = arith.constant 0 : index
    %c0_2 = arith.constant 0 : index
    %c0_3 = arith.constant 0 : index
    %1 = vector.load %arg4[%c0_1, %c0_2, %c0_3] : memref<1x16x128xbf16, #tpu.memory_space<vmem>>, vector<1x16x128xbf16>
    %2 = vector.shape_cast %1 : vector<1x16x128xbf16> to vector<16x128xbf16>
    %cst = arith.constant dense<0.000000e+00> : vector<32x128xf32>
    %3 = tpu.matmul %0, %2, %cst {dimension_numbers = #tpu.dot_dimension_numbers<[1], [0], [0], [1], [0, 0, 1, 1], [], []>} : vector<32x16xbf16>, vector<16x128xbf16>, vector<32x128xf32> -> vector<32x128xf32>
    %c0_4 = arith.constant 0 : index
    %c0_5 = arith.constant 0 : index
    %c0_6 = arith.constant 0 : index
    %4 = vector.load %arg5[%c0_4, %c0_5, %c0_6] : memref<1x32x128xf32, #tpu.memory_space<vmem>>, vector<1x32x128xf32>
    %5 = vector.shape_cast %4 : vector<1x32x128xf32> to vector<32x128xf32>
    %6 = vector.shape_cast %3 : vector<32x128xf32> to vector<1x32x128xf32>
    tpu.vector_store %arg5[%c0_4, %c0_5, %c0_6], %6 {strides = array<i32>} : memref<1x32x128xf32, #tpu.memory_space<vmem>>, vector<1x32x128xf32>,
    return
  }
  func.func @transform_0(%arg0: i32, %arg1: i32, %arg2: i32) -> (i32, i32) {
    %c0_i32 = arith.constant 0 : i32
    %c0_i32_0 = arith.constant 0 : i32
    return %arg1, %c0_i32 : i32, i32
  }
  func.func @transform_1(%arg0: i32, %arg1: i32, %arg2: i32) -> (i32, i32, i32) {
    %c0_i32 = arith.constant 0 : i32
    %c0_i32_0 = arith.constant 0 : i32
    return %arg0, %c0_i32, %arg2 : i32, i32, i32
  }
  func.func @transform_2(%arg0: i32, %arg1: i32, %arg2: i32) -> (i32, i32, i32) {
    %c0_i32 = arith.constant 0 : i32
    return %arg0, %arg1, %arg2 : i32, i32, i32
  }
}

</mosaic_0001>

<bundles_post_ra>
// kernel: conv_transpose2d_pallas.1
= control target key start
LH: loop header
LB: loop body
LE: loop exit
PB: predicated region body
PF: predicated region fallthrough
CT: control target
= control target key end

     0   :  { %s626_s9 = smov 0   ;;  %s628_s10 = smov 0   ;;  %s728_s0 = inlined_call_operand.vmem [shape: bf16[32,16], index: 0, kind: input, shape index: {}]   ;;  %s729_s1 = inlined_call_operand.vmem [shape: bf16[2,16,384], index: 1, kind: input, shape index: {}]   ;;  %s730_s2 = inlined_call_operand.vmem [shape: f32[2,32,384], index: 2, kind: output, shape index: {}]  }
   0x1   :  { %s630_s11 = smov 0   ;;  %s632_s12 = smov 0  }
   0x2   :  { %s634_s13 = smov 0   ;;  %s636_s14 = smov 0  }
   0x3   :  { %s638_s15 = smov 0  }
   0x4 LB: > { %s24_s16 = sadd.s32 1, %s601_s13  ;;  %s31_s17 = sadd.s32 1, %s605_s14  ;;  %s609_s15 = sphi %s638_s15, %s12_s15   ;;  %s605_s14 = sphi %s636_s14, %s737_s14   ;;  %s601_s13 = sphi %s634_s13, %s736_s13   ;;  %s597_s12 = sphi %s632_s12, %s735_s12   ;;  %s593_s11 = sphi %s630_s11, %s734_s11   ;;  %s589_s10 = sphi %s628_s10, %s733_s10   ;;  %s585_s9 = sphi %s626_s9, %s732_s9  }
   0x5   : > { %p25_p0 = scmp.ge.s32.totalorder %s24_s16, 3  ;;  %s466_s18 = sadd.s32 4294967295, %s609_s15  }
   0x6   : > { %p73_p1 = scmp.ne.s32.totalorder %s589_s10, %s585_s9  ;;  %p74_p2 = scmp.eq.s32.totalorder %s609_s15, 0 }
   0x7   : > { %s739_s16 = smov (%p25_p0, %s24_s16), 0  ;;  %s741_s17 = smov (!%p25_p0, %s31_s17), %s605_s14 }
   0x8   : > { %p33_p3 = scmp.ge.s32.totalorder %s741_s17, 2  ;;  %p107_p4 = scmp.eq.s32.totalorder %s466_s18, 5 }
   0x9   : > { %s62_s19 = ssub.s32 %s601_s13, %s739_s16  ;;  %p75_p5 = por %p74_p2, %p73_p1 }
   0xa   : > { %s743_s17 = smov (%p33_p3, %s741_s17), 0  ;;  %p674_p6 = por %p107_p4, %p73_p1 }
   0xb   : > { %s61_s21 = ssub.s32 %s605_s14, %s743_s17  ;;  %s66_s23 = sadd.s32 1, %s589_s10 }
   0xc   : > { %s63_s22 = sor.u32 %s62_s19, %s61_s21  ;;  %p470_p8 = scmp.ge.s32.totalorder %s609_s15, 6 }
   0xd   : > { %p64_p7 = scmp.eq.s32.totalorder %s63_s22, 0 }
   0xe   : > { %138 = sbr.rel (%p470_p8) target bundleno = 29 (0x1d), region = 20 }
   0xf   : > { %s682_s24 = scalar_select %p64_p7, %s589_s10, %s66_s23  }
  0x15   : > { %141 = sbr.rel (!%p75_p5) target bundleno = 29 (0x1d), region = 24  ;;  %s143_s25 = sand.u32 (%p75_p5), 1, %s589_s10  }
  0x16   : > { %s494_s26 = smul.u32 (%p75_p5), 6, %s605_s14  ;;  %s471_s27 = sshll.u32 (%p75_p5), %s143_s25, 3 }
  0x17   : > { %s145_s5 = scalar_lea.vmem (%p75_p5), [#allocation2], %s471_s27 }
  0x18   : > { %s147_s28 = sadd.s32 (%p75_p5), %s601_s13, %s494_s26 }
  0x19   : > { %s472_s29 = sshll.u32 (%p75_p5), %s147_s28, 2 }
  0x1a   : > { %s149_s4 = scalar_lea.vmem (%p75_p5), %s729_s1, %s472_s29 }
  0x1b   : > { %v165_v0 = vld [vmem:[%s149_s4] sm:$0xf] (%p75_p5)  ;;  %v167_v1 = vld [vmem:[%s149_s4 + $0xc] sm:$0xf] (%p75_p5) }
  0x1c   : > { %166 = vst [vmem:[%s145_s5] sm:$0xf] %v165_v0  ;;  %168 = vst [vmem:[%s145_s5 + $0x4] sm:$0xf] %v167_v1 }
  0x1d PF: > { %p473_p9 = scmp.ge.s32.totalorder %s609_s15, 1  ;;  %p194_p10 = scmp.lt.s32.totalorder %s609_s15, 7 }
  0x1f   : > { %p195_p11 = pnand %p473_p9, %p194_p10 }
  0x20   : > { %s201_s6 = sand.u32 (!%p195_p11), 1, %s585_s9   ;;  %v553_v2 = vld [vmem:[%s728_s0] sm:$0xff] (!%p195_p11)   ;;  %vm256_vm0 = vcmask (!%p195_p11), 130048   ;;  %v554_v4 = vld [vmem:[%s728_s0 + $0x8] sm:$0xff] (!%p195_p11)  }
  0x21   : > { %198 = sbr.rel (%p195_p11) target bundleno = 264 (0x108), region = 65  ;;  %s474_s18 = sshll.u32 (!%p195_p11), %s201_s6, 3  ;;  %490 = vmatprep.mubr.msk.bf16.mxu0 (!%p195_p11), %vm256_vm0, %v553_v2 }
  0x22   : > { %s203_s19 = scalar_lea.vmem (!%p195_p11), [#allocation2], %s474_s18  ;;  %s475_s23 = sshll.u32 (!%p195_p11), %s201_s6, 5 }
  0x23   : > { %v552_v3 = vld [vmem:[%s203_s19] sm:$0xff] (!%p195_p11)   ;;  %s225_s25 = scalar_lea.vmem (!%p195_p11), [#allocation3], %s475_s23 }
  0x24   : > { %488 = vmatprep.subr.bf16.mxu0 (!%p195_p11), %v552_v3 }
  0x25   : > { %489 = vmatpush3.bf16.msra.mxu0 (!%p195_p11), %v552_v3 }
  0x28   : > { %491 = vmatmul.mubr.msk.bf16.vlgmr.msra.gmra.mrb[0].mxu0 %vm256_vm0, %v554_v4  ;;  %s495_s9 = smul.u32 (%p674_p6), 12, %s597_s12 }
  0x2a   : > { %s327_s26 = sadd.s32 (%p674_p6), %s593_s11, %s495_s9 }
  0x2b   : > { %s482_s27 = sshll.u32 (%p674_p6), %s327_s26, 3 }
  0x2c   : > { %s329_s30 = scalar_lea.vmem (%p674_p6), %s730_s2, %s482_s27 }
  0xf9   : > { %322 = sbr.rel (!%p674_p6) target bundleno = 264 (0x108), region = 73 }
  0xfb   : > { %v492_v5 = vpop.f32.mrb[0].mxu0 }
  0xfc   : > { %314 = vst [vmem:[%s225_s25 + $0x10] sm:$0xff] %v492_v5  ;;  %v297_v6 = vpop.f32.mrb[1].mxu0 }
  0xfd   : > { %312 = vst [vmem:[%s225_s25] sm:$0xff] %v297_v6  ;;  %v493_v7 = vpop.f32.mrb[2].mxu0 }
  0xfe   : > { %315 = vst [vmem:[%s225_s25 + $0x18] sm:$0xff] %v493_v7  ;;  %v300_v8 = vpop.f32.mrb[3].mxu0 }
  0xff   : > { %313 = vst [vmem:[%s225_s25 + $0x8] sm:$0xff] %v300_v8 }
 0x103   : > { %v367_v11 = vld [vmem:[%s225_s25 + $0x10] sm:$0xff] }
 0x104   : > { %v363_v9 = vld [vmem:[%s225_s25] sm:$0xff]  ;;  %368 = vst [vmem:[%s329_s30 + $0x30] sm:$0xff] %v367_v11 }
 0x105   : > { %v369_v12 = vld [vmem:[%s225_s25 + $0x18] sm:$0xff]  ;;  %364 = vst [vmem:[%s329_s30] sm:$0xff] %v363_v9 }
 0x106   : > { %v365_v10 = vld [vmem:[%s225_s25 + $0x8] sm:$0xff]  ;;  %370 = vst [vmem:[%s329_s30 + $0x48] sm:$0xff] %v369_v12 }
 0x107   : > { %366 = vst [vmem:[%s329_s30 + $0x18] sm:$0xff] %v365_v10 }
 0x108 PF: > { %s12_s15 = sadd.s32 1, %s609_s15   ;;  %s732_s9 = smov %s589_s10 }
 0x109   : > { %p9_p12 = scmp.ge.s32.totalorder %s12_s15, 8   ;;  %s733_s10 = smov %s682_s24 }
 0x10a   : > { %s734_s11 = smov %s601_s13  ;;  %s735_s12 = smov %s605_s14 }
 0x10b   : > { %s736_s13 = smov %s739_s16  ;;  %s737_s14 = smov %s743_s17 }
 0x10c   :  { %11 = sbr.rel (!%p9_p12) target bundleno = 4 (0x4), region = 145 }

</bundles_post_ra>
